<compile_context>
chip_gen: v6e
topology: v6e:2x2x1
jax: 0.10.0
libtpu: 0.0.40
codegen_flags: <defaults>
</compile_context>

<pallas_src>
import functools
import math

import jax
import jax.numpy as jnp
from jax.experimental import pallas as pl
from jax.experimental.pallas import tpu as pltpu


_SMALL_FALLBACK_ELEMS = 1 << 16            # below this, XLA's fused reduction wins

_DEFAULT_TILE_BUDGET = 8 * 1024 * 1024     # v7x-safe (64 MiB physical VMEM)
_DEFAULT_VMEM_LIMIT = 48 * 1024 * 1024     # leaves >=16 MiB headroom on v7x
_BIG_VMEM_TILE_BUDGET = 16 * 1024 * 1024   # v5e / v6e class (128 MiB VMEM)
_BIG_VMEM_LIMIT = 80 * 1024 * 1024


def _round_up(v: int, m: int) -> int:
    return ((v + m - 1) // m) * m


def _round_down(v: int, m: int) -> int:
    return (v // m) * m


def _sublane_unit(itemsize: int) -> int:
    # Minimum efficient sublane multiple per dtype: f32 -> 8, bf16 -> 16, i8 -> 32.
    return max(8, 32 // max(1, itemsize))


@functools.lru_cache(maxsize=None)
def _device_budgets():
    """(tile_budget_bytes, vmem_limit_bytes); generation aware, v7x-safe default."""
    tile_budget = _DEFAULT_TILE_BUDGET
    vmem_limit = _DEFAULT_VMEM_LIMIT
    try:
        info = pltpu.get_tpu_info()
        vmem = getattr(info, "vmem_capacity_bytes", None)
        if vmem is not None and int(vmem) >= 100 * 1024 * 1024:   # v5e / v6e class
            tile_budget = _BIG_VMEM_TILE_BUDGET
            vmem_limit = _BIG_VMEM_LIMIT
    except Exception:
        pass
    return tile_budget, vmem_limit


# ---------------------------------------------------------------------------
# Kernels
# ---------------------------------------------------------------------------
def _mean_mid_single_kernel(x_ref, o_ref, *, scale: float):
    """Whole K in one block: x (TO, K, TI) -> o (TO, TI). No scratch needed."""
    x = x_ref[...].astype(jnp.float32)
    o_ref[...] = (jnp.sum(x, axis=1) * scale).astype(o_ref.dtype)


def _mean_mid_multi_kernel(x_ref, o_ref, acc_ref, *, k_total: int, tk: int,
                           n_k: int, scale: float):
    """K tiled: x (TO, TK, TI), acc (TO, TI) f32, o (TO, TI)."""
    kk = pl.program_id(2)

    @pl.when(kk == 0)
    def _():
        acc_ref[...] = jnp.zeros_like(acc_ref)

    if k_total % tk == 0:
        acc_ref[...] += jnp.sum(x_ref[...].astype(jnp.float32), axis=1)
    else:
        # Unmasked fast path for every K block except the ragged last one.
        @pl.when(kk < n_k - 1)
        def _():
            acc_ref[...] += jnp.sum(x_ref[...].astype(jnp.float32), axis=1)

        @pl.when(kk == n_k - 1)
        def _():
            k_idx = (n_k - 1) * tk + jax.lax.broadcasted_iota(
                jnp.int32, (1, tk, 1), 1)
            x = jnp.where(k_idx < k_total, x_ref[...].astype(jnp.float32), 0.0)
            acc_ref[...] += jnp.sum(x, axis=1)

    @pl.when(kk == n_k - 1)
    def _():
        o_ref[...] = (acc_ref[...] * scale).astype(o_ref.dtype)


def _mean_last_single_kernel(x_ref, o_ref, *, scale: float):
    """inner == 1, whole K in one block: x (TO, K) -> o (TO, 1)."""
    x = x_ref[...].astype(jnp.float32)
    o_ref[...] = (jnp.sum(x, axis=1, keepdims=True) * scale).astype(o_ref.dtype)


def _mean_last_multi_kernel(x_ref, o_ref, acc_ref, *, k_total: int, tk: int,
                            n_k: int, scale: float):
    """inner == 1, K tiled: x (TO, TK), acc (TO, 1) f32, o (TO, 1)."""
    kk = pl.program_id(1)

    @pl.when(kk == 0)
    def _():
        acc_ref[...] = jnp.zeros_like(acc_ref)

    if k_total % tk == 0:
        acc_ref[...] += jnp.sum(x_ref[...].astype(jnp.float32), axis=1,
                                keepdims=True)
    else:
        @pl.when(kk < n_k - 1)
        def _():
            acc_ref[...] += jnp.sum(x_ref[...].astype(jnp.float32), axis=1,
                                    keepdims=True)

        @pl.when(kk == n_k - 1)
        def _():
            col = (n_k - 1) * tk + jax.lax.broadcasted_iota(jnp.int32, (1, tk), 1)
            x = jnp.where(col < k_total, x_ref[...].astype(jnp.float32), 0.0)
            acc_ref[...] += jnp.sum(x, axis=1, keepdims=True)

    @pl.when(kk == n_k - 1)
    def _():
        o_ref[...] = (acc_ref[...] * scale).astype(o_ref.dtype)


# ---------------------------------------------------------------------------
# Static, padding-aware tile selection (Python ints, trace time)
# ---------------------------------------------------------------------------
def _choose_tiles_3d(outer, k, inner, itemsize, budget):
    """(TO, TK, TI) for an (outer, k, inner) layout; block bytes account for
    sublane (dtype-min) and lane (128) padding."""
    sub = _sublane_unit(itemsize)
    ti = inner if inner <= 512 else 512          # lane tile (full dim or 128-mult)
    ti_pad = _round_up(ti, 128)
    k_pad = _round_up(k, sub)
    row_bytes = k_pad * ti_pad * itemsize        # one padded outer-row, whole K

    if min(outer, sub) * row_bytes <= budget:
        # Whole reduced dim fits: no K tiling.
        tk = k
        to = max(1, budget // row_bytes)
        if to >= outer:
            to = outer
        else:
            to = min(outer, max(sub, _round_down(to, sub)))
        # If `outer` capped the block far below budget, widen the lane tile.
        if to == outer and ti < inner:
            lanes = budget // max(1, outer * k_pad * itemsize)
            lanes = _round_down(lanes, 128)
            if lanes >= _round_up(inner, 128):
                ti = inner
            elif lanes > ti_pad:
                ti = lanes
    else:
        # Reduced dim too large for one block: tile K (accumulator path).
        to = min(outer, sub)
        tk_aff = budget // max(1, to * ti_pad * itemsize)
        tk = max(sub, _round_down(tk_aff, sub))
        if tk >= k:
            tk = k
    return to, tk, ti


def _choose_tiles_2d(outer, k, itemsize, budget):
    """(TO, TK) for the inner == 1 layout of shape (outer, k)."""
    sub = _sublane_unit(itemsize)
    k_pad = _round_up(k, 128)
    if sub * k_pad * itemsize <= budget:
        to = budget // (k_pad * itemsize)
        if to >= outer:
            to = outer
        else:
            to = min(outer, max(sub, _round_down(to, sub)))
        return to, k
    # Very large K: tile K too (128-multiples on the lane axis).
    to = min(outer, 256)
    if to < outer:
        to = max(sub, _round_down(to, sub))
    tk_aff = budget // max(1, _round_up(to, sub) * itemsize)
    tk = max(128, _round_down(tk_aff, 128))
    if tk >= k:
        tk = k
    return to, tk


# ---------------------------------------------------------------------------
# pallas_call drivers
# ---------------------------------------------------------------------------
def _mean_mid_pallas(x3, outer, k, inner, scale, out_dtype, tile_budget, vmem_limit):
    itemsize = jnp.dtype(x3.dtype).itemsize
    to, tk, ti = _choose_tiles_3d(outer, k, inner, itemsize, tile_budget)
    n_o = pl.cdiv(outer, to)
    n_i = pl.cdiv(inner, ti)
    n_k = pl.cdiv(k, tk)

    if n_k == 1:
        kernel = functools.partial(_mean_mid_single_kernel, scale=scale)
        return pl.pallas_call(
            kernel,
            out_shape=jax.ShapeDtypeStruct((outer, inner), out_dtype),
            grid_spec=pltpu.PrefetchScalarGridSpec(
                num_scalar_prefetch=0,
                grid=(n_o, n_i),
                in_specs=[pl.BlockSpec((to, k, ti), lambda o, i: (o, 0, i))],
                out_specs=pl.BlockSpec((to, ti), lambda o, i: (o, i)),
            ),
            compiler_params=pltpu.CompilerParams(
                dimension_semantics=("parallel", "parallel"),
                vmem_limit_bytes=vmem_limit,
            ),
        )(x3)

    kernel = functools.partial(_mean_mid_multi_kernel, k_total=k, tk=tk,
                               n_k=n_k, scale=scale)
    return pl.pallas_call(
        kernel,
        out_shape=jax.ShapeDtypeStruct((outer, inner), out_dtype),
        grid_spec=pltpu.PrefetchScalarGridSpec(
            num_scalar_prefetch=0,
            grid=(n_o, n_i, n_k),
            in_specs=[pl.BlockSpec((to, tk, ti), lambda o, i, kk: (o, kk, i))],
            out_specs=pl.BlockSpec((to, ti), lambda o, i, kk: (o, i)),
            scratch_shapes=[pltpu.VMEM((to, ti), jnp.float32)],
        ),
        compiler_params=pltpu.CompilerParams(
            dimension_semantics=("parallel", "parallel", "arbitrary"),
            vmem_limit_bytes=vmem_limit,
        ),
    )(x3)


def _mean_last_pallas(x2, outer, k, scale, out_dtype, tile_budget, vmem_limit):
    itemsize = jnp.dtype(x2.dtype).itemsize
    to, tk = _choose_tiles_2d(outer, k, itemsize, tile_budget)
    n_o = pl.cdiv(outer, to)
    n_k = pl.cdiv(k, tk)

    if n_k == 1:
        kernel = functools.partial(_mean_last_single_kernel, scale=scale)
        return pl.pallas_call(
            kernel,
            out_shape=jax.ShapeDtypeStruct((outer, 1), out_dtype),
            grid_spec=pltpu.PrefetchScalarGridSpec(
                num_scalar_prefetch=0,
                grid=(n_o,),
                in_specs=[pl.BlockSpec((to, k), lambda o: (o, 0))],
                out_specs=pl.BlockSpec((to, 1), lambda o: (o, 0)),
            ),
            compiler_params=pltpu.CompilerParams(
                dimension_semantics=("parallel",),
                vmem_limit_bytes=vmem_limit,
            ),
        )(x2)

    kernel = functools.partial(_mean_last_multi_kernel, k_total=k, tk=tk,
                               n_k=n_k, scale=scale)
    return pl.pallas_call(
        kernel,
        out_shape=jax.ShapeDtypeStruct((outer, 1), out_dtype),
        grid_spec=pltpu.PrefetchScalarGridSpec(
            num_scalar_prefetch=0,
            grid=(n_o, n_k),
            in_specs=[pl.BlockSpec((to, tk), lambda o, kk: (o, kk))],
            out_specs=pl.BlockSpec((to, 1), lambda o, kk: (o, 0)),
            scratch_shapes=[pltpu.VMEM((to, 1), jnp.float32)],
        ),
        compiler_params=pltpu.CompilerParams(
            dimension_semantics=("parallel", "arbitrary"),
            vmem_limit_bytes=vmem_limit,
        ),
    )(x2)


# ---------------------------------------------------------------------------
# Public wrapper
# ---------------------------------------------------------------------------
def mean_reduction(x: jax.Array, dim: int, *,
                   tile_budget_bytes: int | None = None,
                   vmem_limit_bytes: int | None = None,
                   small_fallback_elems: int = _SMALL_FALLBACK_ELEMS) -> jax.Array:
    """Mean over `dim`, with `dim` removed (== torch.mean(x, dim))."""
    if dim < 0:
        dim += x.ndim
    if not 0 <= dim < x.ndim:
        raise ValueError(f"dim {dim} out of range for rank {x.ndim}")

    shape = x.shape
    k = int(shape[dim])
    out_shape = shape[:dim] + shape[dim + 1:]

    # Degenerate / tiny problems: launch + pipeline overhead exceeds data movement.
    if x.size == 0 or k == 0 or x.size <= small_fallback_elems:
        return jnp.mean(x, axis=dim)
    if k == 1:
        return x.reshape(out_shape)

    if tile_budget_bytes is None or vmem_limit_bytes is None:
        def_tb, def_vl = _device_budgets()
        tile_budget_bytes = def_tb if tile_budget_bytes is None else tile_budget_bytes
        vmem_limit_bytes = def_vl if vmem_limit_bytes is None else vmem_limit_bytes

    outer = int(math.prod(shape[:dim]))
    inner = int(math.prod(shape[dim + 1:]))
    scale = 1.0 / k

    if inner == 1:
        # Reduce over the last (contiguous) dim: (outer, K), lane reduce.
        x2 = x.reshape(outer, k)
        out2 = _mean_last_pallas(x2, outer, k, scale, x.dtype,
                                 tile_budget_bytes, vmem_limit_bytes)
        return out2.reshape(out_shape)

    if 1 < inner < 128:
        # Small-inner densification: fold g K-groups into the lane axis with a
        # pure contiguous reshape; fold the g per-group partials in tiny XLA.
        g_max = 128 // inner
        g = 1
        for cand in range(min(g_max, max(k // 8, 1)), 1, -1):
            if k % cand == 0:
                g = cand
                break
        if g > 1:
            xr = x.reshape(outer, k // g, g * inner)
            partial = _mean_mid_pallas(xr, outer, k // g, g * inner, scale,
                                       jnp.float32, tile_budget_bytes,
                                       vmem_limit_bytes)
            out2 = jnp.sum(partial.reshape(outer, g, inner), axis=1).astype(x.dtype)
            return out2.reshape(out_shape)

    # General path: (outer, K, inner), reduce the middle axis.
    x3 = x.reshape(outer, k, inner)
    out2 = _mean_mid_pallas(x3, outer, k, inner, scale, x.dtype,
                            tile_budget_bytes, vmem_limit_bytes)
    return out2.reshape(out_shape)


class ModelNew:
    """JAX/Pallas equivalent of the PyTorch ModelNew: mean over `self.dim`."""

    def __init__(self, dim: int, *, small_fallback_elems: int = _SMALL_FALLBACK_ELEMS):
        self.dim = dim
        self._small_fallback_elems = small_fallback_elems

    def __call__(self, x: jax.Array) -> jax.Array:
        return mean_reduction(x, self.dim,
                              small_fallback_elems=self._small_fallback_elems)


if __name__ == "__main__":
    key = jax.random.PRNGKey(0)

    # ModelNew(dim=1) forward on a small 4-D tensor (force the Pallas path).
    model = ModelNew(1, small_fallback_elems=0)
    x = jax.random.normal(key, (2, 4, 16, 16), dtype=jnp.float32)
    out = jax.block_until_ready(model(x))
    ref = jnp.mean(x, axis=1)
    assert out.shape == ref.shape, (out.shape, ref.shape)
    assert jnp.allclose(out, ref, atol=1e-5, rtol=1e-5), "mismatch vs jnp.mean"

    # Tiny sanity checks exercising each tiling path.
    def _check(shape, dim, dtype=jnp.float32, atol=1e-5, **kw):
        xx = jax.random.normal(key, shape, dtype=dtype)
        got = jax.block_until_ready(
            mean_reduction(xx, dim, small_fallback_elems=0, **kw))
        rr = jnp.mean(xx.astype(jnp.float32), axis=dim)
        assert got.shape == rr.shape, (shape, dim, got.shape, rr.shape)
        assert jnp.allclose(got.astype(jnp.float32), rr, atol=atol, rtol=1e-4), (shape, dim)

    _check((2, 16, 32), dim=2)                                   # last-dim lane path
    _check((4, 64, 32), dim=1)                                   # small-inner densified path
    _check((10, 16, 256), dim=1, tile_budget_bytes=64 * 1024)    # K-tiled acc + ragged outer
    _check((8, 600), dim=-1, tile_budget_bytes=4 * 1024)         # last-dim K-tiled + ragged K
    _check((6, 48, 128), dim=1, dtype=jnp.bfloat16, atol=2e-2)   # bf16 sublane-unit path

    print("KERNEL_OK")
</pallas_src>

<mosaic_0001>
module attributes {stable_mosaic.version = 11 : i64} {
  func.func @_mean_mid_single_kernel(%arg0: i32, %arg1: i32, %arg2: memref<2x4x256xf32, #tpu.memory_space<vmem>>, %arg3: memref<2x256xf32, #tpu.memory_space<vmem>>) attributes {dimension_semantics = [#tpu.dimension_semantics<parallel>, #tpu.dimension_semantics<parallel>], iteration_bounds = array<i64: 1, 1>, scalar_prefetch = 0 : i64, scratch_operands = 0 : i64, tpu.core_type = #tpu.core_type<tc>, window_params = [{transform_indices = @transform_0, window_bounds = array<i64: 2, 4, 256>}, {transform_indices = @transform_1, window_bounds = array<i64: 2, 256>}]} {
    %c0 = arith.constant 0 : index
    %c0_0 = arith.constant 0 : index
    %c0_1 = arith.constant 0 : index
    %0 = vector.load %arg2[%c0, %c0_0, %c0_1] : memref<2x4x256xf32, #tpu.memory_space<vmem>>, vector<2x4x256xf32>
    %cst = arith.constant dense<0.000000e+00> : vector<2x256xf32>
    %1 = vector.multi_reduction <add>, %0, %cst [1] : vector<2x4x256xf32> to vector<2x256xf32>
    %cst_2 = arith.constant 2.500000e-01 : f32
    %2 = vector.broadcast %cst_2 : f32 to vector<2x256xf32>
    %3 = arith.mulf %1, %2 : vector<2x256xf32>
    %c0_3 = arith.constant 0 : index
    %c0_4 = arith.constant 0 : index
    %4 = vector.load %arg3[%c0_3, %c0_4] : memref<2x256xf32, #tpu.memory_space<vmem>>, vector<2x256xf32>
    tpu.vector_store %arg3[%c0_3, %c0_4], %3 {strides = array<i32>} : memref<2x256xf32, #tpu.memory_space<vmem>>, vector<2x256xf32>,
    return
  }
  func.func @transform_0(%arg0: i32, %arg1: i32) -> (i32, i32, i32) {
    %c0_i32 = arith.constant 0 : i32
    %c0_i32_0 = arith.constant 0 : i32
    return %arg0, %c0_i32, %arg1 : i32, i32, i32
  }
  func.func @transform_1(%arg0: i32, %arg1: i32) -> (i32, i32) {
    %c0_i32 = arith.constant 0 : i32
    return %arg0, %arg1 : i32, i32
  }
}

</mosaic_0001>

<bundles_post_ra>
// kernel: tpu_custom_call.1
= control target key start
LH: loop header
LB: loop body
LE: loop exit
PB: predicated region body
PF: predicated region fallthrough
CT: control target
= control target key end

     0   :  { %6 = vsyncpa [#allocation3], 0  ;;  %s186_s0 = inlined_call_operand.hbm [shape: f32[2,4,256], index: 0, kind: input, shape index: {}]   ;;  %s187_s1 = inlined_call_operand.hbm [shape: f32[2,256], index: 1, kind: output, shape index: {}]  }
   0x1   :  { %7 = vsyncpa [#allocation4], 0  ;;  %s165_s6 = smov [#allocation2]  }
   0x2   :  { %s13_s7 = sshll.u32 %s165_s6, 4  ;;  %s14_s7 = int_to_ptr.vmem [resolvable:$true] %s13_s7 }
   0x3   :  { %s129_s8 = scalar_lea.vmem %s14_s7, 256  ;;  %p134_p1 = scmp.lt.s32.totalorder %s14_s7, %s14_s7 }
   0x4   :  { %p130_p0 = scmp.ne.s32.totalorder %s14_s7, %s129_s8  ;;  %p135_p2 = scmp.lt.s32.totalorder %s129_s8, %s129_s8 }
   0x6   :  { %p136_p3 = por %p135_p2, %p134_p1 }
   0x8   :  { %p137_p4 = pnand %p136_p3, %p130_p0 }
   0xa   :  { %140 = shalt.err (!%p137_p4)
}
   0xb   :  { %s166_s9 = smov 128   ;;  %s167_s10 = smov 8  }
   0xc   :  { %19 = dma.hbm_to_vmem [thread:$0]  %s186_s0, 256, %s14_s7, [#allocation3], %s166_s9, %s166_s9, %s167_s10  }
   0xd   :  { %161 = dma.done.wait [#allocation3], 256  }
   0xe   :  { %162 = vsyncadd [#allocation3], 4294967040  ;;  %vm31_vm0 = vcmask 1043456   ;;  %v23_v0 = vld [vmem:[#allocation2] sm:$0xff]  ;;  %v24_v1 = vld [vmem:[#allocation2 + $0x8] sm:$0xff]  ;;  %v72_v20 = vlaneseq  ;;  %vm89_vm1 = vcmask 1041409  }
   0xf   :  { %v27_v2 = vcombine.high %v23_v0, %v23_v0  ;;  %v28_v3 = vcombine.high %v24_v1, %v24_v1  ;;  %v32_v4 = vsel %vm31_vm0, %v23_v0, 0.0  ;;  %v46_v5 = vsel %vm31_vm0, %v24_v1, 0.0  ;;  %s169_s0 = smov [#allocation5]  }
  0x10   :  { %v33_v6 = vrot.slane %v32_v4, 4  ;;  %v47_v7 = vrot.slane %v46_v5, 4  ;;  %v168_v18 = vmov 1983009808   ;;  %v73_v30 = vshrl.u32 %v72_v20, 7  ;;  %s105_s13 = sshll.u32 %s169_s0, 4  ;;  %s106_s13 = int_to_ptr.vmem [resolvable:$true] %s105_s13 }
  0x11   :  { %v39_v8 = vsel %vm31_vm0, %v27_v2, 0.0  ;;  %v53_v9 = vsel %vm31_vm0, %v28_v3, 0.0  ;;  %v70_v19 = vunpack.c.l.s4 %v168_v18  ;;  %vm91_vm2 = vcmask 1043459   ;;  %s141_s14 = scalar_lea.vmem %s106_s13, 64  ;;  %p146_p6 = scmp.lt.s32.totalorder %s106_s13, %s106_s13 }
  0x12   :  { %v34_v10 = vadd.f32 %v33_v6, %v32_v4  ;;  %v40_v11 = vrot.slane %v39_v8, 4  ;;  %v48_v12 = vadd.f32 %v47_v7, %v46_v5  ;;  %v54_v13 = vrot.slane %v53_v9, 4  ;;  %p142_p5 = scmp.ne.s32.totalorder %s106_s13, %s141_s14  ;;  %p147_p7 = scmp.lt.s32.totalorder %s141_s14, %s141_s14 }
  0x13   :  { %v71_v29 = vunpack.c.0.s8 %v70_v19  ;;  %vm93_vm3 = vcmask 1045509   ;;  %vm95_vm4 = vcmask 1047559  }
  0x14   :  { %v35_v14 = vrot.slane %v34_v10, 2  ;;  %v41_v15 = vadd.f32 %v40_v11, %v39_v8  ;;  %v49_v16 = vrot.slane %v48_v12, 2  ;;  %v55_v17 = vadd.f32 %v54_v13, %v53_v9  ;;  %p148_p8 = por %p147_p7, %p146_p6 }
  0x15   :  { %v74_v41 = vsub.s32 %v71_v29, %v73_v30 }
  0x16   :  { %v36_v21 = vadd.f32 %v35_v14, %v34_v10  ;;  %v42_v22 = vrot.slane %v41_v15, 2  ;;  %v50_v23 = vadd.f32 %v49_v16, %v48_v12  ;;  %v56_v24 = vrot.slane %v55_v17, 2  ;;  %p149_p9 = pnand %p148_p8, %p142_p5 }
  0x18   :  { %v37_v25 = vrot.slane %v36_v21, 1  ;;  %v43_v26 = vadd.f32 %v42_v22, %v41_v15  ;;  %v51_v27 = vrot.slane %v50_v23, 1  ;;  %v57_v28 = vadd.f32 %v56_v24, %v55_v17 }
  0x1a   :  { %v38_v31 = vadd.f32 %v37_v25, %v36_v21  ;;  %v44_v32 = vrot.slane %v43_v26, 1  ;;  %v52_v33 = vadd.f32 %v51_v27, %v50_v23  ;;  %v58_v34 = vrot.slane %v57_v28, 1 }
  0x1c   :  { %v45_v35 = vadd.f32 %v44_v32, %v43_v26  ;;  %v59_v36 = vadd.f32 %v58_v34, %v57_v28  ;;  %v60_v37 = vmul.f32 0.25, %v38_v31  ;;  %v62_v38 = vmul.f32 0.25, %v52_v33 }
  0x1e   :  { %v61_v39 = vmul.f32 0.25, %v45_v35  ;;  %v63_v40 = vmul.f32 0.25, %v59_v36 }
  0x20   :  { %v68_v42 = vcombine.low %v60_v37, %v61_v39  ;;  %v76_v43 = vcombine.low %v62_v38, %v63_v40 }
  0x22   :  { %v75_v44 = vrot.slane %v68_v42, %v74_v41  ;;  %v83_v45 = vrot.slane %v76_v43, %v74_v41 }
  0x24   :  { %v88_v46 = vrot.slane %v83_v45, 7 }
  0x26   :  { %v90_v47 = vsel %vm89_vm1, %v88_v46, %v75_v44 }
  0x27   :  { %v92_v48 = vsel %vm91_vm2, %v88_v46, %v90_v47 }
  0x28   :  { %v94_v49 = vsel %vm93_vm3, %v88_v46, %v92_v48 }
  0x29   :  { %v96_v50 = vsel %vm95_vm4, %v88_v46, %v94_v49 }
  0x2a   :  { %98 = vst [vmem:[#allocation5] sm:$0xf] %v96_v50 }
  0x2b   :  { %152 = shalt.err (!%p149_p9)
}
  0x2c   :  { %108 = dma.vmem_to_hbm [thread:$0]  %s106_s13, 64, %s187_s1, [#allocation4]  }
  0x2d   :  { %163 = dma.done.wait [#allocation4], 64  }
  0x2e   :  { %164 = vsyncadd [#allocation4], 4294967232 }
  0x2f   :  { %112 = vsyncpa [#allocation3], 1 }
  0x30   :  { %113 = vsyncpa [#allocation4], 1 }

</bundles_post_ra>
